<compile_context>
chip_gen: v5e
topology: v5e:2x2
jax: 0.10.0
libtpu: 0.0.40
codegen_flags: <defaults>
</compile_context>

<pallas_src>
import jax
import jax.numpy as jnp
import numpy as np
from jax.experimental import pallas as pl
from jax.experimental.pallas import tpu as pltpu


def _attention_kernel(x_ref, c_ref, m_ref, win_ref, bin_ref, wctx_ref, bctx_ref,
                      v_ref, hid_ref, alpha_ref):
    tb, sp = m_ref.shape          # static: batch block, padded seq
    hp = win_ref.shape[1]         # lane-padded hidden dim (multiple of 128)

    # input_linear over the batch block: (TB, D) @ (D, Hp) + b_in
    inp = jnp.dot(x_ref[...], win_ref[...],
                  preferred_element_type=jnp.float32) + bin_ref[...]       # (TB, Hp)

    # context_linear (1x1 conv == per-position linear), fused over TB*Sp rows
    ctx2 = jnp.dot(c_ref[...], wctx_ref[...],
                   preferred_element_type=jnp.float32) + bctx_ref[...]     # (TB*Sp, Hp)
    ctx3 = ctx2.reshape(tb, sp, hp)        # Sp % 8 == 0 -> tile-aligned, free

    # tanh(inp + ctx) with the input projection broadcast over seq positions
    t = jnp.tanh(ctx3 + inp[:, None, :])                                   # (TB, Sp, Hp)

    # att[b, s] = sum_h V[h] * t[b, s, h]   (VPU mul + lane reduce)
    att = jnp.sum(t * v_ref[...][None, :, :], axis=-1)                     # (TB, Sp)

    # att[mask] = -inf (seq-padding is pre-masked; fully-masked rows -> NaN,
    # matching the torch module)
    att = jnp.where(m_ref[...] > 0.5, -jnp.inf, att)

    # exact softmax over the (lane) seq axis
    m_max = jnp.max(att, axis=-1, keepdims=True)
    e = jnp.exp(att - m_max)
    denom = jnp.sum(e, axis=-1, keepdims=True)
    alpha = e / denom                                                       # (TB, Sp)
    alpha_ref[...] = alpha

    # hidden[b, h] = sum_s alpha[b, s] * ctx[b, s, h]  (VPU mul + sublane reduce)
    hid_ref[...] = jnp.sum(alpha[:, :, None] * ctx3, axis=1)               # (TB, Hp)


def attention_forward(inp, context, mask, params, *, block_b=None,
                      matmul_dtype=jnp.float32):
    B, D = inp.shape
    S = context.shape[1]
    H = params["W_in"].shape[1]

    LANE, SUB = 128, 8
    Hp = ((H + LANE - 1) // LANE) * LANE       # lane-dense hidden output
    Sp = ((S + SUB - 1) // SUB) * SUB          # sublane-aligned seq (layout-safe reshape)

    f32 = jnp.float32
    mm_dt = jnp.dtype(matmul_dtype)
    in_item = mm_dt.itemsize

    # --- VMEM footprint model: double-buffered in/out blocks + resident weights
    #     + ~4 live (TB, Sp, Hp) f32 intermediates (proj / tanh / alpha-product).
    def _footprint(tb):
        dbl_in = 2 * tb * (D * in_item + Sp * D * in_item + Sp * 4)
        dbl_out = 2 * tb * (Hp * 4 + Sp * 4)
        interm = 4 * tb * Sp * Hp * 4
        weights = 2 * (2 * D * Hp * in_item + 3 * Hp * 4)
        return dbl_in + dbl_out + interm + weights

    # --- block sizing: ~1024 fused slab rows per step, VMEM-capped, and >=2
    #     grid steps when B >= 2 so v7x can shard across its two TensorCores.
    if block_b is None:
        ROWS_TARGET = 1024
        VMEM_BUDGET = 22 << 20                 # headroom under v7x 32 MiB scoped / 64 MiB phys
        tb = max(SUB, (ROWS_TARGET // Sp) // SUB * SUB)
        while tb > SUB and _footprint(tb) > VMEM_BUDGET:
            tb -= SUB
        tb = min(tb, ((B + SUB - 1) // SUB) * SUB)          # never exceed (padded) batch
        if B >= 2:                                          # allow a 2-way grid split
            half = (B + 1) // 2
            tb = min(tb, ((half + SUB - 1) // SUB) * SUB)
        block_b = max(SUB, tb)
    TB = block_b

    nblk = -(-B // TB)
    if B >= 2 and nblk < 2:
        nblk = 2                                            # v7x: keep both TCs busy
    Bp = nblk * TB

    # --- pad inputs. Padded batch rows are unmasked over real positions
    #     (finite softmax on zeros, sliced off); padded seq positions are
    #     masked (1.0) so alpha there is exactly 0.
    x = jnp.pad(inp.astype(mm_dt), ((0, Bp - B), (0, 0)))
    ctx_in = jnp.pad(context.astype(mm_dt), ((0, Bp - B), (0, Sp - S), (0, 0)))
    m = jnp.pad(mask.astype(f32), ((0, Bp - B), (0, Sp - S)),
                constant_values=((0.0, 0.0), (0.0, 1.0)))
    ctx2 = ctx_in.reshape(Bp * Sp, D)          # fused slab: one matmul per grid step

    # --- zero-pad the hidden dim of weights once (padded columns contribute 0).
    def pad_h(a, dt):
        a = a.astype(dt)
        return jnp.pad(a, [(0, 0)] * (a.ndim - 1) + [(0, Hp - H)])

    W_in, W_ctx = pad_h(params["W_in"], mm_dt), pad_h(params["W_ctx"], mm_dt)
    b_in, b_ctx = pad_h(params["b_in"], f32), pad_h(params["b_ctx"], f32)
    V = pad_h(params["V"], f32)

    vmem_limit = int(min(max(2 * _footprint(TB), 32 << 20), 64 << 20))

    grid_spec = pltpu.PrefetchScalarGridSpec(
        num_scalar_prefetch=0,
        grid=(nblk,),
        in_specs=[
            pl.BlockSpec((TB, D), lambda b: (b, 0)),          # input block
            pl.BlockSpec((TB * Sp, D), lambda b: (b, 0)),     # fused context rows
            pl.BlockSpec((TB, Sp), lambda b: (b, 0)),         # mask block
            pl.BlockSpec((D, Hp), lambda b: (0, 0)),          # W_in   (resident)
            pl.BlockSpec((1, Hp), lambda b: (0, 0)),          # b_in   (resident)
            pl.BlockSpec((D, Hp), lambda b: (0, 0)),          # W_ctx  (resident)
            pl.BlockSpec((1, Hp), lambda b: (0, 0)),          # b_ctx  (resident)
            pl.BlockSpec((1, Hp), lambda b: (0, 0)),          # V      (resident)
        ],
        out_specs=[
            pl.BlockSpec((TB, Hp), lambda b: (b, 0)),         # hidden (lane-dense)
            pl.BlockSpec((TB, Sp), lambda b: (b, 0)),         # alpha
        ],
    )

    hidden_p, alpha_p = pl.pallas_call(
        _attention_kernel,
        out_shape=(jax.ShapeDtypeStruct((Bp, Hp), f32),
                   jax.ShapeDtypeStruct((Bp, Sp), f32)),
        grid_spec=grid_spec,
        compiler_params=pltpu.CompilerParams(
            dimension_semantics=("parallel",),
            vmem_limit_bytes=vmem_limit),
    )(x, ctx2, m, W_in, b_in, W_ctx, b_ctx, V)

    return hidden_p[:B, :H], alpha_p[:B, :S]


def attention_reference(inp, context, mask, params):
    """Pure-JAX reference mirroring the torch forward."""
    inp_lin = inp @ params["W_in"] + params["b_in"]                               # (B, H)
    ctx = jnp.einsum("bsd,dh->bsh", context, params["W_ctx"]) + params["b_ctx"]   # (B, S, H)
    t = jnp.tanh(ctx + inp_lin[:, None, :])
    att = jnp.einsum("bsh,h->bs", t, params["V"][0])
    att = jnp.where(mask > 0.5, -jnp.inf, att)
    alpha = jax.nn.softmax(att, axis=1)
    hidden = jnp.einsum("bs,bsh->bh", alpha, ctx)
    return hidden, alpha


if __name__ == "__main__":
    key = jax.random.PRNGKey(0)
    B, S, D, H = 2, 8, 16, 32   # batch, seq, input_dim, hidden_dim
    ks = jax.random.split(key, 8)

    # Deterministic parameter init (shapes follow the torch module __init__).
    bound = 1.0 / np.sqrt(D)
    W_lin = jax.random.uniform(ks[0], (H, D), jnp.float32, -bound, bound)      # nn.Linear weight
    b_lin = jax.random.uniform(ks[1], (H,), jnp.float32, -bound, bound)        # nn.Linear bias
    W_conv = jax.random.uniform(ks[2], (H, D, 1), jnp.float32, -bound, bound)  # Conv1d weight
    b_conv = jax.random.uniform(ks[3], (H,), jnp.float32, -bound, bound)       # Conv1d bias
    V = jax.random.uniform(ks[4], (H,), jnp.float32, -1.0, 1.0)                # V ~ U(-1, 1)

    params = {
        "W_in": W_lin.T,                 # (D, H)
        "b_in": b_lin.reshape(1, H),
        "W_ctx": W_conv[:, :, 0].T,      # (D, H)  -- 1x1 conv == per-position linear
        "b_ctx": b_conv.reshape(1, H),
        "V": V.reshape(1, H),
    }

    inp = jax.random.normal(ks[5], (B, D), jnp.float32)          # hidden state h
    context = jax.random.normal(ks[6], (B, S, D), jnp.float32)   # attention context
    mask = (jnp.zeros((B, S), jnp.bool_)
            .at[0, 0].set(True)
            .at[1, 3].set(True)).astype(jnp.float32)             # 1.0 == masked

    hidden, alpha = attention_forward(inp, context, mask, params)
    jax.block_until_ready((hidden, alpha))

    hid_ref, alpha_ref = attention_reference(inp, context, mask, params)
    # f32 end-to-end, exact softmax divide; small headroom for MXU f32
    # multi-pass and EUP tanh rounding vs XLA.
    np.testing.assert_allclose(np.asarray(hidden), np.asarray(hid_ref), rtol=1e-3, atol=1e-3)
    np.testing.assert_allclose(np.asarray(alpha), np.asarray(alpha_ref), rtol=1e-3, atol=1e-3)

    print("KERNEL_OK")
</pallas_src>

<mosaic_0001>
module attributes {stable_mosaic.version = 11 : i64} {
  func.func @_attention_kernel(%arg0: i32, %arg1: memref<8x16xf32, #tpu.memory_space<vmem>>, %arg2: memref<64x16xf32, #tpu.memory_space<vmem>>, %arg3: memref<8x8xf32, #tpu.memory_space<vmem>>, %arg4: memref<16x128xf32, #tpu.memory_space<vmem>>, %arg5: memref<1x128xf32, #tpu.memory_space<vmem>>, %arg6: memref<16x128xf32, #tpu.memory_space<vmem>>, %arg7: memref<1x128xf32, #tpu.memory_space<vmem>>, %arg8: memref<1x128xf32, #tpu.memory_space<vmem>>, %arg9: memref<8x128xf32, #tpu.memory_space<vmem>>, %arg10: memref<8x8xf32, #tpu.memory_space<vmem>>) attributes {dimension_semantics = [#tpu.dimension_semantics<parallel>], iteration_bounds = array<i64: 2>, scalar_prefetch = 0 : i64, scratch_operands = 0 : i64, tpu.core_type = #tpu.core_type<tc>, window_params = [{transform_indices = @transform_0, window_bounds = array<i64: 8, 16>}, {transform_indices = @transform_1, window_bounds = array<i64: 64, 16>}, {transform_indices = @transform_2, window_bounds = array<i64: 8, 8>}, {pipeline_mode = #tpu.pipeline_mode<synchronous>, transform_indices = @transform_3, window_bounds = array<i64: 16, 128>}, {pipeline_mode = #tpu.pipeline_mode<synchronous>, transform_indices = @transform_4, window_bounds = array<i64: 1, 128>}, {pipeline_mode = #tpu.pipeline_mode<synchronous>, transform_indices = @transform_5, window_bounds = array<i64: 16, 128>}, {pipeline_mode = #tpu.pipeline_mode<synchronous>, transform_indices = @transform_6, window_bounds = array<i64: 1, 128>}, {pipeline_mode = #tpu.pipeline_mode<synchronous>, transform_indices = @transform_7, window_bounds = array<i64: 1, 128>}, {transform_indices = @transform_8, window_bounds = array<i64: 8, 128>}, {transform_indices = @transform_9, window_bounds = array<i64: 8, 8>}]} {
    %c0 = arith.constant 0 : index
    %c0_0 = arith.constant 0 : index
    %0 = vector.load %arg1[%c0, %c0_0] : memref<8x16xf32, #tpu.memory_space<vmem>>, vector<8x16xf32>
    %c0_1 = arith.constant 0 : index
    %c0_2 = arith.constant 0 : index
    %1 = vector.load %arg4[%c0_1, %c0_2] : memref<16x128xf32, #tpu.memory_space<vmem>>, vector<16x128xf32>
    %cst = arith.constant dense<0.000000e+00> : vector<8x128xf32>
    %2 = tpu.matmul %0, %1, %cst {dimension_numbers = #tpu.dot_dimension_numbers<[1], [0], [0], [1], [0, 0, 1, 1], [], []>} : vector<8x16xf32>, vector<16x128xf32>, vector<8x128xf32> -> vector<8x128xf32>
    %c0_3 = arith.constant 0 : index
    %c0_4 = arith.constant 0 : index
    %3 = vector.load %arg5[%c0_3, %c0_4] : memref<1x128xf32, #tpu.memory_space<vmem>>, vector<1x128xf32>
    %4 = vector.broadcast %3 : vector<1x128xf32> to vector<8x128xf32>
    %5 = arith.addf %2, %4 : vector<8x128xf32>
    %c0_5 = arith.constant 0 : index
    %c0_6 = arith.constant 0 : index
    %6 = vector.load %arg2[%c0_5, %c0_6] : memref<64x16xf32, #tpu.memory_space<vmem>>, vector<64x16xf32>
    %c0_7 = arith.constant 0 : index
    %c0_8 = arith.constant 0 : index
    %7 = vector.load %arg6[%c0_7, %c0_8] : memref<16x128xf32, #tpu.memory_space<vmem>>, vector<16x128xf32>
    %cst_9 = arith.constant dense<0.000000e+00> : vector<64x128xf32>
    %8 = tpu.matmul %6, %7, %cst_9 {dimension_numbers = #tpu.dot_dimension_numbers<[1], [0], [0], [1], [0, 0, 1, 1], [], []>} : vector<64x16xf32>, vector<16x128xf32>, vector<64x128xf32> -> vector<64x128xf32>
    %c0_10 = arith.constant 0 : index
    %c0_11 = arith.constant 0 : index
    %9 = vector.load %arg7[%c0_10, %c0_11] : memref<1x128xf32, #tpu.memory_space<vmem>>, vector<1x128xf32>
    %10 = vector.broadcast %9 : vector<1x128xf32> to vector<64x128xf32>
    %11 = arith.addf %8, %10 : vector<64x128xf32>
    %12 = vector.shape_cast %11 : vector<64x128xf32> to vector<8x8x128xf32>
    %13 = vector.shape_cast %5 : vector<8x128xf32> to vector<8x1x128xf32>
    %14 = vector.broadcast %13 : vector<8x1x128xf32> to vector<8x8x128xf32>
    %15 = arith.addf %12, %14 : vector<8x8x128xf32>
    %16 = math.tanh %15 : vector<8x8x128xf32>
    %c0_12 = arith.constant 0 : index
    %c0_13 = arith.constant 0 : index
    %17 = vector.load %arg8[%c0_12, %c0_13] : memref<1x128xf32, #tpu.memory_space<vmem>>, vector<1x128xf32>
    %18 = vector.shape_cast %17 : vector<1x128xf32> to vector<1x1x128xf32>
    %19 = vector.broadcast %18 : vector<1x1x128xf32> to vector<8x8x128xf32>
    %20 = arith.mulf %16, %19 : vector<8x8x128xf32>
    %cst_14 = arith.constant dense<0.000000e+00> : vector<8x8xf32>
    %21 = vector.multi_reduction <add>, %20, %cst_14 [2] : vector<8x8x128xf32> to vector<8x8xf32>
    %c0_15 = arith.constant 0 : index
    %c0_16 = arith.constant 0 : index
    %22 = vector.load %arg3[%c0_15, %c0_16] : memref<8x8xf32, #tpu.memory_space<vmem>>, vector<8x8xf32>
    %cst_17 = arith.constant 5.000000e-01 : f32
    %23 = vector.broadcast %cst_17 : f32 to vector<8x8xf32>
    %24 = arith.cmpf ogt, %22, %23 : vector<8x8xf32>
    %cst_18 = arith.constant 0xFF800000 : f32
    %25 = vector.broadcast %cst_18 : f32 to vector<8x8xf32>
    %26 = arith.select %24, %25, %21 : vector<8x8xi1>, vector<8x8xf32>
    %cst_19 = arith.constant dense<0xFF800000> : vector<8xf32>
    %27 = vector.multi_reduction <maximumf>, %26, %cst_19 [1] : vector<8x8xf32> to vector<8xf32>
    %28 = vector.shape_cast %27 : vector<8xf32> to vector<8x1xf32>
    %29 = vector.broadcast %28 : vector<8x1xf32> to vector<8x8xf32>
    %30 = arith.subf %26, %29 : vector<8x8xf32>
    %31 = math.exp %30 : vector<8x8xf32>
    %cst_20 = arith.constant dense<0.000000e+00> : vector<8xf32>
    %32 = vector.multi_reduction <add>, %31, %cst_20 [1] : vector<8x8xf32> to vector<8xf32>
    %33 = vector.shape_cast %32 : vector<8xf32> to vector<8x1xf32>
    %34 = vector.broadcast %33 : vector<8x1xf32> to vector<8x8xf32>
    %35 = arith.divf %31, %34 : vector<8x8xf32>
    %c0_21 = arith.constant 0 : index
    %c0_22 = arith.constant 0 : index
    %36 = vector.load %arg10[%c0_21, %c0_22] : memref<8x8xf32, #tpu.memory_space<vmem>>, vector<8x8xf32>
    tpu.vector_store %arg10[%c0_21, %c0_22], %35 {strides = array<i32>} : memref<8x8xf32, #tpu.memory_space<vmem>>, vector<8x8xf32>,
    %37 = vector.shape_cast %35 : vector<8x8xf32> to vector<8x8x1xf32>
    %38 = vector.broadcast %37 : vector<8x8x1xf32> to vector<8x8x128xf32>
    %39 = arith.mulf %38, %12 : vector<8x8x128xf32>
    %cst_23 = arith.constant dense<0.000000e+00> : vector<8x128xf32>
    %40 = vector.multi_reduction <add>, %39, %cst_23 [1] : vector<8x8x128xf32> to vector<8x128xf32>
    %c0_24 = arith.constant 0 : index
    %c0_25 = arith.constant 0 : index
    %41 = vector.load %arg9[%c0_24, %c0_25] : memref<8x128xf32, #tpu.memory_space<vmem>>, vector<8x128xf32>
    tpu.vector_store %arg9[%c0_24, %c0_25], %40 {strides = array<i32>} : memref<8x128xf32, #tpu.memory_space<vmem>>, vector<8x128xf32>,
    return
  }
  func.func @transform_0(%arg0: i32) -> (i32, i32) {
    %c0_i32 = arith.constant 0 : i32
    %c0_i32_0 = arith.constant 0 : i32
    return %arg0, %c0_i32 : i32, i32
  }
  func.func @transform_1(%arg0: i32) -> (i32, i32) {
    %c0_i32 = arith.constant 0 : i32
    %c0_i32_0 = arith.constant 0 : i32
    return %arg0, %c0_i32 : i32, i32
  }
  func.func @transform_2(%arg0: i32) -> (i32, i32) {
    %c0_i32 = arith.constant 0 : i32
    %c0_i32_0 = arith.constant 0 : i32
    return %arg0, %c0_i32 : i32, i32
  }
  func.func @transform_3(%arg0: i32) -> (i32, i32) {
    %c0_i32 = arith.constant 0 : i32
    %c0_i32_0 = arith.constant 0 : i32
    %c0_i32_1 = arith.constant 0 : i32
    return %c0_i32, %c0_i32_0 : i32, i32
  }
  func.func @transform_4(%arg0: i32) -> (i32, i32) {
    %c0_i32 = arith.constant 0 : i32
    %c0_i32_0 = arith.constant 0 : i32
    %c0_i32_1 = arith.constant 0 : i32
    return %c0_i32, %c0_i32_0 : i32, i32
  }
  func.func @transform_5(%arg0: i32) -> (i32, i32) {
    %c0_i32 = arith.constant 0 : i32
    %c0_i32_0 = arith.constant 0 : i32
    %c0_i32_1 = arith.constant 0 : i32
    return %c0_i32, %c0_i32_0 : i32, i32
  }
  func.func @transform_6(%arg0: i32) -> (i32, i32) {
    %c0_i32 = arith.constant 0 : i32
    %c0_i32_0 = arith.constant 0 : i32
    %c0_i32_1 = arith.constant 0 : i32
    return %c0_i32, %c0_i32_0 : i32, i32
  }
  func.func @transform_7(%arg0: i32) -> (i32, i32) {
    %c0_i32 = arith.constant 0 : i32
    %c0_i32_0 = arith.constant 0 : i32
    %c0_i32_1 = arith.constant 0 : i32
    return %c0_i32, %c0_i32_0 : i32, i32
  }
  func.func @transform_8(%arg0: i32) -> (i32, i32) {
    %c0_i32 = arith.constant 0 : i32
    %c0_i32_0 = arith.constant 0 : i32
    return %arg0, %c0_i32 : i32, i32
  }
  func.func @transform_9(%arg0: i32) -> (i32, i32) {
    %c0_i32 = arith.constant 0 : i32
    %c0_i32_0 = arith.constant 0 : i32
    return %arg0, %c0_i32 : i32, i32
  }
}

</mosaic_0001>

<bundles_post_ra>
// kernel: tpu_custom_call.1
= control target key start
LH: loop header
LB: loop body
LE: loop exit
PB: predicated region body
PF: predicated region fallthrough
CT: control target
= control target key end

     0   :  { %15 = vsyncpa [#allocation3], 0  ;;  %s1264_s0 = inlined_call_operand.vmem [shape: f32[16,16], index: 0, kind: input, shape index: {}]   ;;  %s1265_s1 = inlined_call_operand.vmem [shape: f32[128,16], index: 1, kind: input, shape index: {}]   ;;  %s1266_s2 = inlined_call_operand.vmem [shape: f32[16,8], index: 2, kind: input, shape index: {}]   ;;  %s1267_s3 = inlined_call_operand.vmem [shape: f32[16,128], index: 3, kind: input, shape index: {}]   ;;  %s1268_s4 = inlined_call_operand.vmem [shape: f32[1,128], index: 4, kind: input, shape index: {}]   ;;  %s1269_s5 = inlined_call_operand.vmem [shape: f32[16,128], index: 5, kind: input, shape index: {}]   ;;  %s1270_s6 = inlined_call_operand.vmem [shape: f32[1,128], index: 6, kind: input, shape index: {}]   ;;  %s1271_s7 = inlined_call_operand.vmem [shape: f32[1,128], index: 7, kind: input, shape index: {}]   ;;  %s1272_s8 = inlined_call_operand.hbm [shape: f32[16,128], index: 8, kind: output, shape index: {0}]   ;;  %s1273_s9 = inlined_call_operand.vmem [shape: f32[16,8], index: 9, kind: output, shape index: {1}]  }
   0x1   :  { %17 = vsyncpa [#allocation3 + $0x1], 0  ;;  %s1083_s30 = smov 0   ;;  %s1085_s10 = smov 0  }
   0x2   :  { %s1087_s11 = smov 0   ;;  %s1089_s12 = smov 0  }
   0x3 LB: > { %s876_s13 = sadd.s32 4294967295, %s1031_s12   ;;  %s877_s14 = sadd.s32 4294967294, %s1031_s12   ;;  %s1031_s12 = sphi %s1089_s12, %s1279_s12   ;;  %s1027_s11 = sphi %s1087_s11, %s1278_s11   ;;  %s1023_s10 = sphi %s1085_s10, %s1277_s10   ;;  %s1019_s30 = sphi %s1083_s30, %s1276_s30  }
   0x4   : > { %s1106_s15 = sadd.s32 1, %s1031_s12   ;;  %s213_s16 = sadd.s32 1, %s1027_s11 }
   0x5   : > { %s210_s17 = ssub.s32 %s1031_s12, %s1106_s15  ;;  %p223_p0 = scmp.ne.s32.totalorder %s1027_s11, %s1023_s10 }
   0x6   : > { %p211_p1 = scmp.eq.s32.totalorder %s210_s17, 0  ;;  %p224_p2 = scmp.eq.s32.totalorder %s876_s13, 1 }
   0x7   : > { %p229_p3 = scmp.ne.s32.totalorder %s1023_s10, %s1019_s30  ;;  %p230_p4 = scmp.eq.s32.totalorder %s877_s14, 1 }
   0x8   : > { %s1116_s18 = scalar_select %p211_p1, %s1027_s11, %s213_s16  }
   0x9   : > { %p1118_p5 = por %p224_p2, %p223_p0  ;;  %p1122_p6 = por %p230_p4, %p229_p3 }
   0xa   : > { %p880_p7 = scmp.ge.s32.totalorder %s1031_s12, 1  ;;  %p312_p8 = scmp.lt.s32.totalorder %s1031_s12, 3 }
   0xc   : > { %p313_p9 = pnand %p880_p7, %p312_p8 }
   0xd   : > { %p360_p10 = scmp.lt.s32.totalorder (!%p313_p9), %s876_s13, 1  ;;  %s1137_s27 = sshll.u32 (!%p313_p9), %s876_s13, 3 }
   0xe   : > { %316 = sbr.rel (%p313_p9) target bundleno = 725 (0x2d5), region = 52  ;;  %p365_p11 = scmp.lt.s32.totalorder (!%p313_p9), %s1137_s27, 15 }
   0xf   : > { %s762_s17 = scalar_lea.hbm (!%p313_p9), %s1272_s8, %s1137_s27 }
  0x13   : > { %v380_v0 = vld [vmem:[%s1267_s3 + $0x8] sm:$0xff]  ;;  %v379_v2 = vld [vmem:[%s1267_s3] sm:$0xff]  ;;  %s1281_s13 = smov (!%p360_p10, %s876_s13), 1  ;;  %vm385_vm0 = vcmask 130048   ;;  %vm576_vm1 = vcmask 1041409   ;;  %vm578_vm2 = vcmask 1042434  }
  0x14   : > { %v418_v1 = vld [vmem:[%s1269_s5 + $0x8] sm:$0xff]  ;;  %403 = vmatpush.msra.mxu0 %v380_v0  ;;  %v417_v3 = vld [vmem:[%s1269_s5] sm:$0xff]  ;;  %s366_s14 = scalar_select %p365_p11, %s1137_s27, 15  ;;  %vm580_vm3 = vcmask 1043459   ;;  %vm582_vm4 = vcmask 1044484   ;;  %vm584_vm5 = vcmask 1045509  }
  0x15   : > { %461 = vmatpush.msra.mxu1 %v418_v1  ;;  %900 = vmatpush.msra.mxu2 %v418_v1  ;;  %s1144_s16 = sshll.u32 %s1281_s13, 3  ;;  %v946_v13 = vld [vmem:[%s1268_s4] ss:$0 sm:$0xff]  ;;  %vm586_vm6 = vcmask 1046534   ;;  %vm588_vm7 = vcmask 1047559   ;;  %vm592_vm9 = vcmask 64512  }
  0x16   : > { %901 = vmatpush.msra.mxu3 %v418_v1  ;;  %404 = vmatpush.msra.mxu0 %v379_v2  ;;  %s363_s22 = scalar_lea.vmem %s1264_s0, %s1144_s16  ;;  %s884_s23 = sshll.u32 %s366_s14, 3  ;;  %v947_v14 = vld [vmem:[%s1270_s6] ss:$0 sm:$0xff] }
  0x17   : > { %462 = vmatpush.msra.mxu1 %v417_v3  ;;  %902 = vmatpush.msra.mxu2 %v417_v3  ;;  %v378_v4 = vld [vmem:[%s363_s22] sm:$0xff]  ;;  %s368_s26 = scalar_lea.vmem %s1265_s1, %s884_s23  ;;  %s373_s24 = scalar_lea.vmem %s1266_s2, %s1144_s16 }
  0x18   : > { %903 = vmatpush.msra.mxu3 %v417_v3  ;;  %887 = vmatmul.msk.f32.vlgmr.msra.gmra.mxu0 %vm385_vm0, %v378_v4  ;;  %v409_v5 = vld [vmem:[%s368_s26] sm:$0xff]  ;;  %v412_v6 = vld [vmem:[%s368_s26 + $0x18] sm:$0xff]  ;;  %v415_v7 = vld [vmem:[%s368_s26 + $0x30] sm:$0xff]  ;;  %s377_s13 = scalar_lea.vmem %s1273_s9, %s1144_s16  ;;  %s351_s16 = sand.u32 1, %s1023_s10  }
  0x19   : > { %888 = vmatmul.msk.f32.vlgmr.msra.gmra.mxu1 %vm385_vm0, %v409_v5  ;;  %891 = vmatmul.msk.f32.vlgmr.msra.gmra.mxu2 %vm385_vm0, %v412_v6  ;;  %v410_v8 = vld [vmem:[%s368_s26 + $0x8] sm:$0xff]  ;;  %v413_v9 = vld [vmem:[%s368_s26 + $0x20] sm:$0xff]  ;;  %v416_v10 = vld [vmem:[%s368_s26 + $0x38] sm:$0xff]  ;;  %s881_s28 = sshll.u32 %s351_s16, 3  ;;  %s766_s23 = sshll.u32 %s762_s17, 4  ;;  %s767_s23 = int_to_ptr.hbm [resolvable:$true] %s766_s23 }
  0x1a   : > { %894 = vmatmul.msk.f32.vlgmr.msra.gmra.mxu3 %vm385_vm0, %v415_v7  ;;  %v411_v11 = vld [vmem:[%s368_s26 + $0x10] sm:$0xff]  ;;  %v414_v12 = vld [vmem:[%s368_s26 + $0x28] sm:$0xff]  ;;  %v948_v30 = vld [vmem:[%s1271_s7] ss:$0 sm:$0xff]  ;;  %s353_s21 = scalar_lea.vmem [#allocation2], %s881_s28  ;;  %s748_s27 = scalar_lea.sflag [#allocation3], %s351_s16 }
  0x1b   : > { %s764_s22 = sshll.u32 %s353_s21, 4  ;;  %s989_s28 = scalar_lea.hbm %s1272_s8, 16  ;;  %s765_s22 = int_to_ptr.vmem [resolvable:$true] %s764_s22 }
  0x21   : > { %889 = vmatmul.msk.f32.gmra.mxu1 %vm385_vm0, %v410_v8  ;;  %892 = vmatmul.msk.f32.gmra.mxu2 %vm385_vm0, %v413_v9 }
  0x22   : > { %895 = vmatmul.msk.f32.gmra.mxu3 %vm385_vm0, %v416_v10  ;;  %v566_v10 = vlaneseq }
  0x29   : > { %890 = vmatmul.msk.f32.gmra.mxu1 %vm385_vm0, %v411_v11  ;;  %893 = vmatmul.msk.f32.gmra.mxu2 %vm385_vm0, %v414_v12 }
  0x95   : > { %v406_v15 = vpop.f32.mrf.mxu0 }
  0x96   : > { %v407_v16 = vadd.f32 %v946_v13, %v406_v15  ;;  %v464_v17 = vpop.f32.mrf.mxu1  ;;  %v567_v13 = vand.u32 127, %v566_v10 }
  0x97   : > { %v1168_v18 = vadd.f32 %v947_v14, %v464_v17 }
  0x98   : > { %v496_v19 = vperm.slane %v407_v16, 0  ;;  %v491_v20 = vrot.slane %v407_v16, 3  ;;  %v489_v22 = vrot.slane %v407_v16, 1  ;;  %v494_v25 = vrot.slane %v407_v16, 6 }
  0x99   : > { %v492_v37 = vrot.slane %v407_v16, 4  ;;  %v490_v39 = vrot.slane %v407_v16, 2  ;;  %v495_v45 = vrot.slane %v407_v16, 7  ;;  %v493_v55 = vrot.slane %v407_v16, 5 }
  0x9a   : > { %v512_v21 = vadd.f32 %v496_v19, %v1168_v18  ;;  %v499_v23 = vperm.slane %v491_v20, 0  ;;  %v497_v28 = vperm.slane %v489_v22, 0  ;;  %v502_v34 = vperm.slane %v494_v25, 0 }
  0x9b   : > { %v500_v43 = vperm.slane %v492_v37, 0  ;;  %v498_v50 = vperm.slane %v490_v39, 0  ;;  %v503_v56 = vperm.slane %v495_v45, 0  ;;  %v501_v61 = vperm.slane %v493_v55, 0 }
  0x9c   : > { %949 = vtanh.f32 %v512_v21  ;;  %v473_v24 = vpop.f32.mrf.mxu2 }
  0x9d   : > { %v1171_v26 = vadd.f32 %v947_v14, %v473_v24  ;;  %v482_v27 = vpop.f32.mrf.mxu3 }
  0x9e   : > { %v467_v29 = vpop.f32.mrf.mxu1  ;;  %v1179_v33 = vadd.f32 %v947_v14, %v482_v27 }
  0x9f   : > { %v515_v31 = vadd.f32 %v499_v23, %v1171_v26  ;;  %v1177_v32 = vadd.f32 %v947_v14, %v467_v29 }
  0xa0   : > { %v518_v40 = vadd.f32 %v502_v34, %v1179_v33 }
  0xa1   : > { %951 = vtanh.f32 %v515_v31  ;;  %v513_v36 = vadd.f32 %v497_v28, %v1177_v32  ;;  %v556_v28 = vld [vmem:[%s373_s24] sm:$0xff]  ;;  %s983_s24 = sshra.s32 %s767_s23, 4  ;;  %s984_s24 = int_to_ptr.hbm [resolvable:$true] %s983_s24 }
  0xa2   : > { %v950_v35 = vpop.eup %949  ;;  %vm557_vm8 = vcmp.gt.f32.partialorder %v556_v28, 0.5  ;;  %s985_s25 = scalar_lea.hbm %s984_s24, 8  ;;  %p990_p1 = scmp.lt.s32.totalorder %s984_s24, %s1272_s8 }
  0xa3   : > { %v532_v38 = vmul.f32 %v950_v35, %v948_v30  ;;  %953 = vtanh.f32 %v513_v36  ;;  %p986_p12 = scmp.ne.s32.totalorder %s984_s24, %s985_s25  ;;  %p991_p2 = scmp.lt.s32.totalorder %s989_s28, %s985_s25 }
  0xa4   : > { %v476_v41 = vpop.f32.mrf.mxu2  ;;  %955 = vtanh.f32 %v518_v40 }
  0xa5   : > { %540 = vadd.xlane.f32.xlu0 %v532_v38  ;;  %v1183_v42 = vadd.f32 %v947_v14, %v476_v41  ;;  %v485_v44 = vpop.f32.mrf.mxu3  ;;  %p987_p13 = pnand %p986_p12, %p1118_p5  ;;  %p992_p3 = por %p991_p2, %p990_p1 }
  0xa6   : > { %v470_v46 = vpop.f32.mrf.mxu1  ;;  %v1188_v51 = vadd.f32 %v947_v14, %v485_v44 }
  0xa7   : > { %v952_v47 = vpop.eup %951  ;;  %v516_v48 = vadd.f32 %v500_v43, %v1183_v42  ;;  %v1186_v49 = vadd.f32 %v947_v14, %v470_v46  ;;  %p988_p0 = pneg %p987_p13 }
  0xa8   : > { %v535_v52 = vmul.f32 %v952_v47, %v948_v30  ;;  %v519_v58 = vadd.f32 %v503_v56, %v1188_v51  ;;  %v620_v47 = vshrl.u32 %v566_v10, 7 }
  0xa9   : > { %v954_v53 = vpop.eup %953  ;;  %957 = vtanh.f32 %v516_v48  ;;  %v514_v54 = vadd.f32 %v498_v50, %v1186_v49  ;;  %p993_p4 = pnand %p992_p3, %p988_p0 }
  0xaa   : > { %546 = vadd.xlane.f32.xlu1 %v535_v52  ;;  %v533_v57 = vmul.f32 %v954_v53, %v948_v30  ;;  %v956_v62 = vpop.eup %955  ;;  %945 = vset.pattern.permute.xlu0 %v620_v47 }
  0xab   : > { %959 = vtanh.f32 %v514_v54  ;;  %v538_v4 = vmul.f32 %v956_v62, %v948_v30  ;;  %944 = vset.pattern.permute.xlu2 %v620_v47  ;;  %943 = vset.pattern.permute.xlu1 %v620_v47 }
  0xac   : > { %v479_v59 = vpop.f32.mrf.mxu2  ;;  %961 = vtanh.f32 %v519_v58 }
  0xad   : > { %542 = vadd.xlane.f32.xlu0 %v533_v57  ;;  %v1192_v60 = vadd.f32 %v947_v14, %v479_v59 }
  0xaf   : > { %v958_v63 = vpop.eup %957  ;;  %v517_v0 = vadd.f32 %v501_v61, %v1192_v60 }
  0xb0   : > { %v536_v1 = vmul.f32 %v958_v63, %v948_v30 }
  0xb1   : > { %v960_v2 = vpop.eup %959  ;;  %963 = vtanh.f32 %v517_v0 }
  0xb2   : > { %548 = vadd.xlane.f32.xlu2 %v536_v1  ;;  %v534_v3 = vmul.f32 %v960_v2, %v948_v30  ;;  %v962_v5 = vpop.eup %961 }
  0xb3   : > { %v539_v8 = vmul.f32 %v962_v5, %v948_v30 }
  0xb4   : > { %544 = vadd.xlane.f32.xlu1 %v534_v3 }
  0xb5   : > { %552 = vadd.xlane.f32.xlu0 %v538_v4 }
  0xb7   : > { %v964_v6 = vpop.eup %963 }
  0xb8   : > { %v537_v7 = vmul.f32 %v964_v6, %v948_v30 }
  0xba   : > { %550 = vadd.xlane.f32.xlu2 %v537_v7 }
  0xbc   : > { %554 = vadd.xlane.f32.xlu1 %v539_v8 }
 0x118   : > { %v541_v9 = vpop.xlane.xlu0 %540 }
 0x119   : > { %v568_v16 = vperm.slane %v541_v9, %v567_v13 }
 0x11d   : > { %v547_v11 = vpop.xlane.xlu1 %546 }
 0x11e   : > { %v571_v21 = vperm.slane %v547_v11, %v567_v13 }
 0x120   : > { %v543_v12 = vpop.xlane.xlu0 %542 }
 0x121   : > { %v569_v14 = vperm.slane %v543_v12, %v567_v13 }
 0x123   : > { %v577_v20 = vsel %vm576_vm1, %v569_v14, %v568_v16 }
 0x125   : > { %v549_v15 = vpop.xlane.xlu2 %548 }
 0x126   : > { %v572_v25 = vperm.slane %v549_v15, %v567_v13 }
 0x127   : > { %v545_v17 = vpop.xlane.xlu1 %544 }
 0x128   : > { %v570_v19 = vperm.slane %v545_v17, %v567_v13  ;;  %v553_v24 = vpop.xlane.xlu0 %552 }
 0x129   : > { %v574_v30 = vperm.slane %v553_v24, %v567_v13 }
 0x12a   : > { %v579_v22 = vsel %vm578_vm2, %v570_v19, %v577_v20 }
 0x12b   : > { %v581_v23 = vsel %vm580_vm3, %v571_v21, %v579_v22 }
 0x12c   : > { %v583_v31 = vsel %vm582_vm4, %v572_v25, %v581_v23 }
 0x12d   : > { %v551_v27 = vpop.xlane.xlu2 %550 }
 0x12e   : > { %v573_v29 = vperm.slane %v551_v27, %v567_v13 }
 0x12f   : > { %v555_v34 = vpop.xlane.xlu1 %554 }
 0x130   : > { %v585_v35 = vsel %vm584_vm5, %v573_v29, %v583_v31  ;;  %v575_v36 = vperm.slane %v555_v34, %v567_v13 }
 0x131   : > { %v587_v37 = vsel %vm586_vm6, %v574_v30, %v585_v35 }
 0x132   : > { %v589_v38 = vsel %vm588_vm7, %v575_v36, %v587_v37 }
 0x133   : > { %v591_v39 = vsel %vm557_vm8, -inf, %v589_v38 }
 0x134   : > { %v593_v40 = vsel %vm592_vm9, %v591_v39, -inf }
 0x135   : > { %594 = vmax.xlane.f32.xlu2 %v593_v40 }
 0x1a8   : > { %v595_v41 = vpop.xlane.xlu2 %594 }
 0x1a9   : > { %v596_v43 = vsub.f32 %v591_v39, %v595_v41 }
 0x1ab   : > { %v597_v44 = vmul.f32 1.442695, %v596_v43 }
 0x1ad   : > { %965 = vpow2.f32 %v597_v44 }
 0x1b3   : > { %v966_v45 = vpop.eup %965 }
 0x1b4   : > { %v599_v46 = vsel %vm592_vm9, %v966_v45, 0.0 }
 0x1b5   : > { %600 = vadd.xlane.f32.xlu0 %v599_v46 }
 0x228   : > { %v601_v48 = vpop.xlane.xlu0 %600 }
 0x229   : > { %967 = vrcp.f32 %v601_v48  ;;  %v613_v54 = vand.u32 2147483648, %v601_v48  ;;  %v611_v56 = vand.u32 2147483647, %v601_v48  ;;  %vm607_vm11 = vweird.f32 %v601_v48 }
 0x22b   : > { %v614_v58 = vor.u32 1.1754944e-38, %v613_v54  ;;  %vm612_vm13 = vcmp.eq.f32.partialorder %v611_v56, 8.507059e+37 }
 0x22f   : > { %v968_v50 = vpop.eup %967 }
 0x230   : > { %v603_v52 = vmul.f32 %v968_v50, %v601_v48  ;;  %vm608_vm10 = vweird.f32 %v968_v50 }
 0x231   : > { %vm609_vm12 = vmor %vm607_vm11, %vm608_vm10 }
 0x232   : > { %v604_v53 = vsub.f32 1.0, %v603_v52 }
 0x234   : > { %v605_v55 = vmul.f32 %v968_v50, %v604_v53 }
 0x236   : > { %v606_v57 = vadd.f32 %v968_v50, %v605_v55 }
 0x238   : > { %v610_v59 = vsel %vm609_vm12, %v968_v50, %v606_v57 }
 0x239   : > { %v615_v61 = vsel %vm612_vm13, %v614_v58, %v610_v59 }
 0x23a   : > { %v616_v62 = vmul.f32 %v966_v45, %v615_v61 }
 0x23c   : > { %617 = vst.msk [vmem:[%s377_s13] sm:$0xff] %vm592_vm9, %v616_v62  ;;  %v632_v63 = vperm.slane %v616_v62, 2  ;;  %v625_v0 = vperm.slane %v616_v62, 1  ;;  %v618_v1 = vperm.slane %v616_v62, 0  ;;  %v639_v2 = vperm.slane %v616_v62, 3 }
 0x23d   : > { %v646_v3 = vperm.slane %v616_v62, 4  ;;  %v653_v4 = vperm.slane %v616_v62, 5  ;;  %v660_v5 = vperm.slane %v616_v62, 6  ;;  %v667_v6 = vperm.slane %v616_v62, 7 }
 0x23e   : > { %637 = vperm.xlu0 %945, %v632_v63   ;;  %630 = vperm.xlu2 %944, %v625_v0  }
 0x23f   : > { %623 = vperm.xlu1 %943, %v618_v1  }
 0x246   : > { %644 = vperm.xlu2 %944, %v639_v2  }
 0x247   : > { %651 = vperm.xlu1 %943, %v646_v3  }
 0x24e   : > { %658 = vperm.xlu2 %944, %v653_v4  }
 0x24f   : > { %665 = vperm.xlu1 %943, %v660_v5  }
 0x256   : > { %672 = vperm.xlu2 %944, %v667_v6  }
 0x298   : > { %v631_v7 = vpop.permute.xlu2 %630 }
 0x299   : > { %v675_v10 = vmul.f32 %v631_v7, %v1177_v32 }
 0x29b   : > { %v688_v11 = vrot.slane %v675_v10, 4 }
 0x29d   : > { %v689_v17 = vadd.f32 %v688_v11, %v675_v10 }
 0x29f   : > { %v690_v27 = vrot.slane %v689_v17, 2 }
 0x2a0   : > { %v645_v8 = vpop.permute.xlu2 %644 }
 0x2a1   : > { %v677_v13 = vmul.f32 %v645_v8, %v1171_v26  ;;  %v691_v34 = vadd.f32 %v690_v27, %v689_v17 }
 0x2a3   : > { %v700_v22 = vrot.slane %v677_v13, 4  ;;  %v692_v41 = vrot.slane %v691_v34, 1 }
 0x2a5   : > { %v701_v26 = vadd.f32 %v700_v22, %v677_v13  ;;  %v693_v52 = vadd.f32 %v692_v41, %v691_v34 }
 0x2a7   : > { %v702_v38 = vrot.slane %v701_v26, 2 }
 0x2a8   : > { %v659_v9 = vpop.permute.xlu2 %658 }
 0x2a9   : > { %v679_v23 = vmul.f32 %v659_v9, %v1192_v60  ;;  %v703_v45 = vadd.f32 %v702_v38, %v701_v26 }
 0x2ab   : > { %v712_v30 = vrot.slane %v679_v23, 4  ;;  %v704_v57 = vrot.slane %v703_v45, 1 }
 0x2ad   : > { %v713_v39 = vadd.f32 %v712_v30, %v679_v23 }
 0x2af   : > { %v714_v46 = vrot.slane %v713_v39, 2 }
 0x2b0   : > { %v638_v12 = vpop.permute.xlu0 %637  ;;  %v673_v20 = vpop.permute.xlu2 %672 }
 0x2b1   : > { %v676_v14 = vmul.f32 %v638_v12, %v1186_v49  ;;  %v624_v15 = vpop.permute.xlu1 %623  ;;  %v681_v32 = vmul.f32 %v673_v20, %v1188_v51  ;;  %v715_v58 = vadd.f32 %v714_v46, %v713_v39 }
 0x2b2   : > { %v674_v16 = vmul.f32 %v624_v15, %v1168_v18 }
 0x2b3   : > { %v694_v19 = vrot.slane %v676_v14, 4  ;;  %v724_v35 = vrot.slane %v681_v32, 4  ;;  %v716_v2 = vrot.slane %v715_v58, 1 }
 0x2b4   : > { %v682_v21 = vrot.slane %v674_v16, 4 }
 0x2b5   : > { %v695_v24 = vadd.f32 %v694_v19, %v676_v14  ;;  %v725_v43 = vadd.f32 %v724_v35, %v681_v32  ;;  %v717_v8 = vadd.f32 %v716_v2, %v715_v58 }
 0x2b6   : > { %v683_v25 = vadd.f32 %v682_v21, %v674_v16 }
 0x2b7   : > { %v696_v28 = vrot.slane %v695_v24, 2  ;;  %v726_v53 = vrot.slane %v725_v43, 2 }
 0x2b8   : > { %v684_v29 = vrot.slane %v683_v25, 2 }
 0x2b9   : > { %v652_v49 = vpop.permute.xlu1 %651  ;;  %v697_v36 = vadd.f32 %v696_v28, %v695_v24  ;;  %v727_v62 = vadd.f32 %v726_v53, %v725_v43 }
 0x2ba   : > { %v685_v31 = vadd.f32 %v684_v29, %v683_v25  ;;  %v678_v18 = vmul.f32 %v652_v49, %v1183_v42 }
 0x2bb   : > { %v698_v51 = vrot.slane %v697_v36, 1  ;;  %v728_v4 = vrot.slane %v727_v62, 1 }
 0x2bc   : > { %v706_v37 = vrot.slane %v678_v18, 4  ;;  %v686_v60 = vrot.slane %v685_v31, 1 }
 0x2bd   : > { %v699_v54 = vadd.f32 %v698_v51, %v697_v36  ;;  %v729_v10 = vadd.f32 %v728_v4, %v727_v62 }
 0x2be   : > { %v707_v40 = vadd.f32 %v706_v37, %v678_v18  ;;  %v687_v47 = vadd.f32 %v686_v60, %v685_v31 }
 0x2c0   : > { %v708_v44 = vrot.slane %v707_v40, 2  ;;  %v738_v59 = vsel %vm576_vm1, %v693_v52, %v687_v47 }
 0x2c1   : > { %v666_v48 = vpop.permute.xlu1 %665  ;;  %v739_v63 = vsel %vm578_vm2, %v699_v54, %v738_v59 }
 0x2c2   : > { %v709_v50 = vadd.f32 %v708_v44, %v707_v40  ;;  %v680_v42 = vmul.f32 %v666_v48, %v1179_v33  ;;  %v705_v33 = vadd.f32 %v704_v57, %v703_v45 }
 0x2c4   : > { %v710_v55 = vrot.slane %v709_v50, 1  ;;  %v718_v56 = vrot.slane %v680_v42, 4  ;;  %v740_v5 = vsel %vm580_vm3, %v705_v33, %v739_v63 }
 0x2c6   : > { %v719_v61 = vadd.f32 %v718_v56, %v680_v42  ;;  %v711_v0 = vadd.f32 %v710_v55, %v709_v50 }
 0x2c8   : > { %v720_v1 = vrot.slane %v719_v61, 2  ;;  %v741_v6 = vsel %vm582_vm4, %v711_v0, %v740_v5 }
 0x2c9   : > { %v742_v11 = vsel %vm584_vm5, %v717_v8, %v741_v6 }
 0x2ca   : > { %v721_v3 = vadd.f32 %v720_v1, %v719_v61 }
 0x2cc   : > { %v722_v7 = vrot.slane %v721_v3, 1 }
 0x2ce   : > { %v723_v9 = vadd.f32 %v722_v7, %v721_v3 }
 0x2d0   : > { %v743_v12 = vsel %vm586_vm6, %v723_v9, %v742_v11 }
 0x2d1   : > { %v744_v13 = vsel %vm588_vm7, %v729_v10, %v743_v12 }
 0x2d2   : > { %746 = vst [vmem:[%s353_s21] sm:$0xff] %v744_v13 }
 0x2d3   : > { %996 = shalt.err (!%p993_p4)
}
 0x2d4   : > { %904 = dma.vmem_to_hbm [thread:$0]  (%p1118_p5), %s765_s22, 128, %s767_s23, %s748_s27  }
 0x2d5 PF: > { %p910_p7 = scmp.ge.s32.totalorder %s1031_s12, 2  ;;  %s781_s16 = sand.u32 1, %s1019_s30  }
 0x2d6   : > { %s782_s17 = scalar_lea.sflag [#allocation3], %s781_s16 }
 0x2d7   : > { %p907_p8 = pnand %p910_p7, %p1122_p6 }
 0x2d9   : > { %p908_p9 = pneg %p907_p8 }
 0x2db   : > { %1014 = dma.done.wait (%p908_p9), %s782_s17, 128  }
 0x2dc   : > { %1016 = vsyncadd (%p908_p9), %s782_s17, 4294967168  ;;  %p20_p10 = scmp.ge.s32.totalorder %s1106_s15, 4   ;;  %s1276_s30 = smov %s1023_s10 }
 0x2dd   : > { %s1277_s10 = smov %s1027_s11  ;;  %s1278_s11 = smov %s1116_s18 }
 0x2de   : > { %s1279_s12 = smov %s1106_s15  ;;  %22 = sbr.rel (!%p20_p10) target bundleno = 3 (0x3), region = 105 }
 0x2e3   :  { %795 = vsyncpa [#allocation3], 1 }
 0x2e4   :  { %797 = vsyncpa [#allocation3 + $0x1], 1 }

</bundles_post_ra>
